<compile_context>
chip_gen: v7x
topology: tpu7x:2x2x1
jax: 0.10.0
libtpu: 0.0.40
codegen_flags: <defaults>
</compile_context>

<pallas_src>
import jax
import jax.numpy as jnp
from jax.experimental import pallas as pl
from jax.experimental.pallas import tpu as pltpu


def _round_up(x, m):
    return ((x + m - 1) // m) * m


def _pick_tile(dim, cap, multiple):
    """Largest divisor of `dim` that is <= cap and a multiple of `multiple`."""
    if dim <= cap:
        return dim
    best = multiple
    d = multiple
    while d <= cap:
        if dim % d == 0:
            best = d
        d += multiple
    return best


def _vmem_cap_bytes():
    try:
        return int(pltpu.get_tpu_info().vmem_capacity_bytes)
    except Exception:
        return 64 << 20  # conservative fallback (v7x per-TensorCore VMEM)


def _vmem_limit(needed_bytes, cap_bytes):
    limit = max(needed_bytes + (16 << 20), 32 << 20)
    return int(min(limit, cap_bytes - (8 << 20)))


# ----------------------------------------------------------------------------
# Kernel 1: tiled matmul + bias.  Used for the hoisted xW precompute and the
# final vocab projection.  Grid is (N tiles outer, M tiles inner) so the
# (K, tile_n) weight block is reused across all M tiles without re-DMA.
# ----------------------------------------------------------------------------
def _matmul_bias_kernel(a_ref, w_ref, b_ref, o_ref):
    o_ref[...] = (jnp.dot(a_ref[...], w_ref[...],
                          preferred_element_type=jnp.float32)
                  + b_ref[...]).astype(o_ref.dtype)


def _matmul_bias(a, w, b, out_dtype, *, vmem_cap):
    """(M, K) @ (K, N) + (1, N) -> (M, N) in out_dtype. Dims pre-padded."""
    M, K = a.shape
    N = w.shape[1]
    tile_m = _pick_tile(M, 512, 8)
    tile_n_cap = 2048 if vmem_cap >= (96 << 20) else 1024   # v5e/v6e vs v7x
    tile_n = _pick_tile(N, tile_n_cap, 128)
    # TODO(synk): for very large K on v7x add a K grid axis with a VMEM f32
    # accumulator (+ pl.when init/finalize) instead of keeping full-K blocks.
    needed = (2 * tile_m * K * a.dtype.itemsize
              + 2 * K * tile_n * w.dtype.itemsize
              + 2 * tile_n * 4
              + 2 * tile_m * tile_n * jnp.dtype(out_dtype).itemsize)
    return pl.pallas_call(
        _matmul_bias_kernel,
        out_shape=jax.ShapeDtypeStruct((M, N), out_dtype),
        grid_spec=pltpu.PrefetchScalarGridSpec(
            num_scalar_prefetch=0,
            grid=(N // tile_n, M // tile_m),          # j outer, i inner
            in_specs=[
                pl.BlockSpec((tile_m, K), lambda j, i: (i, 0)),
                pl.BlockSpec((K, tile_n), lambda j, i: (0, j)),   # reused over i
                pl.BlockSpec((1, tile_n), lambda j, i: (0, j)),
            ],
            out_specs=pl.BlockSpec((tile_m, tile_n), lambda j, i: (i, j)),
        ),
        compiler_params=pltpu.CompilerParams(
            dimension_semantics=("parallel", "parallel"),
            vmem_limit_bytes=_vmem_limit(needed, vmem_cap),
        ),
    )(a, w, b)


# ----------------------------------------------------------------------------
# Kernel 2: serial LSTM recurrence.  One grid step == t_chunk decode steps.
# Inputs: precomputed xW stream (x@W_ih + b already folded in) and W_hh only.
# ----------------------------------------------------------------------------
def _lstm_kernel(xw_ref, whh_ref, h_out_ref, h_sc, c_sc):
    """
    xw_ref   : (t_chunk, B_pad, 4*H_pad) f32   precomputed x@W_ih + (b_ih+b_hh)
    whh_ref  : (H_pad, 4*H_pad) compute dtype  hidden-to-hidden weight (gate-padded)
    h_out_ref: (t_chunk, B_pad, H_pad) compute dtype  per-step hidden states
    h_sc,c_sc: (B_pad, H_pad) f32              recurrent state, persists across grid
    """
    t_chunk = xw_ref.shape[0]
    h_pad = h_sc.shape[-1]
    cdt = whh_ref.dtype

    @pl.when(pl.program_id(0) == 0)
    def _():
        h_sc[...] = jnp.zeros_like(h_sc)
        c_sc[...] = jnp.zeros_like(c_sc)

    def step(tt, carry):
        # gates = xW[t] + h_{t-1} @ W_hh   (bf16 MXU inputs, f32 accumulation)
        gates = xw_ref[tt] + jnp.dot(h_sc[...].astype(cdt), whh_ref[...],
                                     preferred_element_type=jnp.float32)
        # Gate slices are lane-aligned (H_pad % 128 == 0).  PyTorch order i,f,g,o.
        i_g = jax.nn.sigmoid(gates[:, 0 * h_pad:1 * h_pad])
        f_g = jax.nn.sigmoid(gates[:, 1 * h_pad:2 * h_pad])
        g_g = jnp.tanh(gates[:, 2 * h_pad:3 * h_pad])
        o_g = jax.nn.sigmoid(gates[:, 3 * h_pad:4 * h_pad])

        c_new = f_g * c_sc[...] + i_g * g_g
        h_new = o_g * jnp.tanh(c_new)

        c_sc[...] = c_new
        h_sc[...] = h_new
        h_out_ref[tt] = h_new.astype(h_out_ref.dtype)
        return carry

    jax.lax.fori_loop(0, t_chunk, step, 0, unroll=True)


# ----------------------------------------------------------------------------
# Wrapper
# ----------------------------------------------------------------------------
def decoder_forward(features, captions, params, *, t_chunk=8,
                    compute_dtype=jnp.bfloat16):
    """Pallas implementation of DecoderRNNUpdated.forward.

    features: (B, E) float32
    captions: (B, T) int32
    returns:  (B, T, V) float32
    """
    f32 = jnp.float32
    cdt = jnp.dtype(compute_dtype)
    B, E = features.shape
    T = captions.shape[1]
    H = params["w_hh"].shape[0]
    V = params["w_lin"].shape[1]

    E_pad = _round_up(E, 128)
    H_pad = _round_up(H, 128)
    V_pad = _round_up(V, 128)
    B_pad = _round_up(B, 8)          # sublane-dense stores / vregs in the recurrence
    T_pad = _round_up(T, t_chunk)
    n_chunks = T_pad // t_chunk
    vmem_cap = _vmem_cap_bytes()

    # --- embedding lookup (gather; plain-JAX glue) + time-major input stream --
    # TODO(synk): for large E/T, fold the gather into the xW kernel via
    # PrefetchScalarGridSpec(num_scalar_prefetch=1) + pl.Element row index maps.
    cap_emb = params["embedding"][captions]                      # (B, T, E)
    xs = jnp.transpose(cap_emb, (1, 0, 2))                       # (T, B, E)
    xs = xs.at[0].set(features)                                  # t=0 uses features
    xs_pad = jnp.zeros((T_pad, B_pad, E_pad), f32).at[:T, :B, :E].set(xs)
    xs_flat = xs_pad.reshape(T_pad * B_pad, E_pad).astype(cdt)

    # --- gate-block-aligned, padded weights (cast to compute dtype) ----------
    w_ih = jnp.zeros((E_pad, 4, H_pad), f32).at[:E, :, :H].set(
        params["w_ih"].reshape(E, 4, H)).reshape(E_pad, 4 * H_pad).astype(cdt)
    w_hh = jnp.zeros((H_pad, 4, H_pad), f32).at[:H, :, :H].set(
        params["w_hh"].reshape(H, 4, H)).reshape(H_pad, 4 * H_pad).astype(cdt)
    b_gates = jnp.zeros((4, H_pad), f32).at[:, :H].set(
        (params["b_ih"] + params["b_hh"]).reshape(4, H)).reshape(1, 4 * H_pad)
    w_lin = jnp.zeros((H_pad, V_pad), f32).at[:H, :V].set(params["w_lin"]).astype(cdt)
    b_lin = jnp.zeros((1, V_pad), f32).at[0, :V].set(params["b_lin"])

    # --- Stage A: hoisted input-to-hidden matmul for ALL timesteps -----------
    xw = _matmul_bias(xs_flat, w_ih, b_gates, f32, vmem_cap=vmem_cap)
    xw = xw.reshape(T_pad, B_pad, 4 * H_pad)

    # --- Stage B: serial recurrence, emits h_t (time-major, lane-dense) ------
    lstm_needed = (
        2 * t_chunk * B_pad * 4 * H_pad * 4          # xW stream (double-buffered)
        + 2 * H_pad * 4 * H_pad * cdt.itemsize       # W_hh (constant index)
        + 2 * t_chunk * B_pad * H_pad * cdt.itemsize # h output (double-buffered)
        + 2 * B_pad * H_pad * 4)                     # h/c scratch
    # TODO(synk): for real batch sizes add a leading 'parallel' B-tile grid axis
    # so v7x's second TensorCore runs an independent batch shard.
    h_all = pl.pallas_call(
        _lstm_kernel,
        out_shape=jax.ShapeDtypeStruct((T_pad, B_pad, H_pad), cdt),
        grid_spec=pltpu.PrefetchScalarGridSpec(
            num_scalar_prefetch=0,
            grid=(n_chunks,),
            in_specs=[
                pl.BlockSpec((t_chunk, B_pad, 4 * H_pad), lambda i: (i, 0, 0)),
                # TODO(synk): pipeline_mode=pl.Buffered(1) here would drop the
                # unused second buffer of this constant-index weight block.
                pl.BlockSpec((H_pad, 4 * H_pad), lambda i: (0, 0)),
            ],
            out_specs=pl.BlockSpec((t_chunk, B_pad, H_pad), lambda i: (i, 0, 0)),
            scratch_shapes=[
                pltpu.VMEM((B_pad, H_pad), f32),     # h state
                pltpu.VMEM((B_pad, H_pad), f32),     # c state
            ],
        ),
        compiler_params=pltpu.CompilerParams(
            dimension_semantics=("arbitrary",),      # time recurrence
            vmem_limit_bytes=_vmem_limit(lstm_needed, vmem_cap),
        ),
    )(xw, w_hh)

    # --- Stage C: batched vocab projection ------------------------------------
    # Layout fix applied to the HIDDENS (cheap), not the logits: transpose the
    # (T_pad, B_pad, H_pad) stream to batch-major so the projection output is
    # already (B, T, V) ordered -> no logits transpose / extra HBM round trip.
    h_bt = jnp.transpose(h_all, (1, 0, 2)).reshape(B_pad * T_pad, H_pad)
    logits = _matmul_bias(h_bt, w_lin, b_lin, f32, vmem_cap=vmem_cap)
    return logits.reshape(B_pad, T_pad, V_pad)[:B, :T, :V]


# ----------------------------------------------------------------------------
# Pure-JAX reference (lax.scan over time) for correctness checking.
# ----------------------------------------------------------------------------
def decoder_forward_ref(features, captions, params):
    B, E = features.shape
    H = params["w_hh"].shape[0]
    cap_emb = params["embedding"][captions]                          # (B, T, E)
    b_gates = params["b_ih"] + params["b_hh"]

    def step(carry, x):
        h, c = carry
        gates = x @ params["w_ih"] + h @ params["w_hh"] + b_gates
        i_g = jax.nn.sigmoid(gates[:, 0 * H:1 * H])
        f_g = jax.nn.sigmoid(gates[:, 1 * H:2 * H])
        g_g = jnp.tanh(gates[:, 2 * H:3 * H])
        o_g = jax.nn.sigmoid(gates[:, 3 * H:4 * H])
        c = f_g * c + i_g * g_g
        h = o_g * jnp.tanh(c)
        out = h @ params["w_lin"] + params["b_lin"]
        return (h, c), out

    xs = jnp.transpose(cap_emb, (1, 0, 2))                           # (T, B, E)
    xs = xs.at[0].set(features)                                      # t=0 uses features
    h0 = jnp.zeros((B, H), jnp.float32)
    c0 = jnp.zeros((B, H), jnp.float32)
    _, outs = jax.lax.scan(step, (h0, c0), xs)                       # (T, B, V)
    return jnp.transpose(outs, (1, 0, 2))


def init_params(key, embed_size, hidden_size, vocab_size):
    """Deterministic synthetic parameters (weights stored pre-transposed,
    gate order i, f, g, o along the 4H axis — PyTorch LSTMCell convention)."""
    ks = jax.random.split(key, 7)
    scale = 0.1
    return {
        "embedding": scale * jax.random.normal(ks[0], (vocab_size, embed_size), jnp.float32),
        "w_ih": scale * jax.random.normal(ks[1], (embed_size, 4 * hidden_size), jnp.float32),
        "w_hh": scale * jax.random.normal(ks[2], (hidden_size, 4 * hidden_size), jnp.float32),
        "b_ih": scale * jax.random.normal(ks[3], (4 * hidden_size,), jnp.float32),
        "b_hh": scale * jax.random.normal(ks[4], (4 * hidden_size,), jnp.float32),
        "w_lin": scale * jax.random.normal(ks[5], (hidden_size, vocab_size), jnp.float32),
        "b_lin": scale * jax.random.normal(ks[6], (vocab_size,), jnp.float32),
    }


if __name__ == "__main__":
    B, T = 2, 8
    embed_size, hidden_size, vocab_size = 32, 32, 64

    key = jax.random.PRNGKey(0)
    k_param, k_feat, k_cap = jax.random.split(key, 3)

    params = init_params(k_param, embed_size, hidden_size, vocab_size)
    features = jax.random.normal(k_feat, (B, embed_size), jnp.float32)
    captions = jax.random.randint(k_cap, (B, T), 0, vocab_size, jnp.int32)

    ref = decoder_forward_ref(features, captions, params)

    # Exact-parity path (f32 matmuls) — tight tolerance.
    out_f32 = decoder_forward(features, captions, params, compute_dtype=jnp.float32)
    out_f32 = jax.block_until_ready(out_f32)
    assert out_f32.shape == (B, T, vocab_size)
    assert jnp.allclose(out_f32, ref, atol=1e-4, rtol=1e-4), "f32 mismatch vs reference"

    # Fast path (bf16 MXU operands, f32 accumulation) — bf16-level tolerance.
    out_bf16 = decoder_forward(features, captions, params, compute_dtype=jnp.bfloat16)
    out_bf16 = jax.block_until_ready(out_bf16)
    assert out_bf16.shape == (B, T, vocab_size)
    assert jnp.allclose(out_bf16, ref, atol=2e-2, rtol=2e-2), "bf16 mismatch vs reference"

    print("KERNEL_OK")
</pallas_src>

<mosaic_0001>
module attributes {stable_mosaic.version = 11 : i64} {
  func.func @_matmul_bias_kernel(%arg0: i32, %arg1: i32, %arg2: memref<64x128xf32, #tpu.memory_space<vmem>>, %arg3: memref<128x512xf32, #tpu.memory_space<vmem>>, %arg4: memref<1x512xf32, #tpu.memory_space<vmem>>, %arg5: memref<64x512xf32, #tpu.memory_space<vmem>>) attributes {dimension_semantics = [#tpu.dimension_semantics<parallel>, #tpu.dimension_semantics<parallel>], iteration_bounds = array<i64: 1, 1>, scalar_prefetch = 0 : i64, scratch_operands = 0 : i64, tpu.core_type = #tpu.core_type<tc>, window_params = [{transform_indices = @transform_0, window_bounds = array<i64: 64, 128>}, {transform_indices = @transform_1, window_bounds = array<i64: 128, 512>}, {transform_indices = @transform_2, window_bounds = array<i64: 1, 512>}, {transform_indices = @transform_3, window_bounds = array<i64: 64, 512>}]} {
    %c0 = arith.constant 0 : index
    %c0_0 = arith.constant 0 : index
    %0 = vector.load %arg2[%c0, %c0_0] : memref<64x128xf32, #tpu.memory_space<vmem>>, vector<64x128xf32>
    %c0_1 = arith.constant 0 : index
    %c0_2 = arith.constant 0 : index
    %1 = vector.load %arg3[%c0_1, %c0_2] : memref<128x512xf32, #tpu.memory_space<vmem>>, vector<128x512xf32>
    %cst = arith.constant dense<0.000000e+00> : vector<64x512xf32>
    %2 = tpu.matmul %0, %1, %cst {dimension_numbers = #tpu.dot_dimension_numbers<[1], [0], [0], [1], [0, 0, 1, 1], [], []>} : vector<64x128xf32>, vector<128x512xf32>, vector<64x512xf32> -> vector<64x512xf32>
    %c0_3 = arith.constant 0 : index
    %c0_4 = arith.constant 0 : index
    %3 = vector.load %arg4[%c0_3, %c0_4] : memref<1x512xf32, #tpu.memory_space<vmem>>, vector<1x512xf32>
    %4 = vector.broadcast %3 : vector<1x512xf32> to vector<64x512xf32>
    %5 = arith.addf %2, %4 : vector<64x512xf32>
    %c0_5 = arith.constant 0 : index
    %c0_6 = arith.constant 0 : index
    %6 = vector.load %arg5[%c0_5, %c0_6] : memref<64x512xf32, #tpu.memory_space<vmem>>, vector<64x512xf32>
    tpu.vector_store %arg5[%c0_5, %c0_6], %5 {strides = array<i32>} : memref<64x512xf32, #tpu.memory_space<vmem>>, vector<64x512xf32>,
    return
  }
  func.func @transform_0(%arg0: i32, %arg1: i32) -> (i32, i32) {
    %c0_i32 = arith.constant 0 : i32
    %c0_i32_0 = arith.constant 0 : i32
    return %arg1, %c0_i32 : i32, i32
  }
  func.func @transform_1(%arg0: i32, %arg1: i32) -> (i32, i32) {
    %c0_i32 = arith.constant 0 : i32
    %c0_i32_0 = arith.constant 0 : i32
    return %c0_i32, %arg0 : i32, i32
  }
  func.func @transform_2(%arg0: i32, %arg1: i32) -> (i32, i32) {
    %c0_i32 = arith.constant 0 : i32
    %c0_i32_0 = arith.constant 0 : i32
    return %c0_i32, %arg0 : i32, i32
  }
  func.func @transform_3(%arg0: i32, %arg1: i32) -> (i32, i32) {
    %c0_i32 = arith.constant 0 : i32
    return %arg1, %arg0 : i32, i32
  }
}

</mosaic_0001>

<bundles_post_ra>
// kernel: tpu_custom_call.1
= control target key start
LH: loop header
LB: loop body
LE: loop exit
PB: predicated region body
PF: predicated region fallthrough
CT: control target
= control target key end

     0   :  { %8 = vsyncpa [#allocation3], 0  ;;  %s686_s0 = inlined_call_operand.hbm [shape: f32[64,128], index: 0, kind: input, shape index: {}]   ;;  %s687_s1 = inlined_call_operand.hbm [shape: f32[128,512], index: 1, kind: input, shape index: {}]   ;;  %s688_s2 = inlined_call_operand.vmem [shape: f32[1,512], index: 2, kind: input, shape index: {}]   ;;  %s689_s3 = inlined_call_operand.hbm [shape: f32[64,512], index: 3, kind: output, shape index: {}]  }
   0x1   :  { %9 = vsyncpa [#allocation6], 0 }
   0x2   :  { %10 = vsyncpa [#allocation4], 0  ;;  %s557_s12 = smov [#allocation2]   ;;  %s485_s16 = scalar_lea.hbm %s686_s0, 1024 }
   0x3   :  { %s16_s13 = sshll.u32 %s557_s12, 4  ;;  %p486_p0 = scmp.ne.s32.totalorder %s686_s0, %s485_s16  ;;  %s17_s13 = int_to_ptr.vmem [resolvable:$true] %s16_s13 }
   0x4   :  { %p489_p1 = scmp.lt.u32.totalorder %s485_s16, %s686_s0 }
   0x6   :  { %p491_p2 = pnand %p489_p1, %p486_p0 }
   0x8   :  { %494 = shalt.err (!%p491_p2)
}
   0x9   :  { %s495_s21 = scalar_lea.vmem %s17_s13, 1024  ;;  %p500_p4 = scmp.lt.s32.totalorder %s17_s13, %s17_s13 }
   0xa   :  { %p496_p3 = scmp.ne.s32.totalorder %s17_s13, %s495_s21  ;;  %p501_p5 = scmp.lt.s32.totalorder %s495_s21, %s495_s21 }
   0xc   :  { %p502_p6 = por %p501_p5, %p500_p4 }
   0xe   :  { %p503_p7 = pnand %p502_p6, %p496_p3 }
  0x10   :  { %506 = shalt.err (!%p503_p7)
}
  0x11   :  { %s558_s22 = smov 128   ;;  %s559_s23 = smov 8  }
  0x12   :  { %22 = dma.hbm_to_vmem [thread:$0]  %s686_s0, 1024, %s17_s13, [#allocation3], %s558_s22, %s558_s22, %s559_s23  }
  0x13   :  { %s560_s26 = smov [#allocation5]   ;;  %s507_s30 = scalar_lea.hbm %s687_s1, 8192 }
  0x14   :  { %s28_s27 = sshll.u32 %s560_s26, 4  ;;  %p508_p8 = scmp.ne.s32.totalorder %s687_s1, %s507_s30  ;;  %s29_s27 = int_to_ptr.vmem [resolvable:$true] %s28_s27 }
  0x15   :  { %p511_p9 = scmp.lt.u32.totalorder %s507_s30, %s687_s1 }
  0x17   :  { %p513_p10 = pnand %p511_p9, %p508_p8 }
  0x19   :  { %516 = shalt.err (!%p513_p10)
}
  0x1a   :  { %s517_s8 = scalar_lea.vmem %s29_s27, 8192  ;;  %p522_p12 = scmp.lt.s32.totalorder %s29_s27, %s29_s27 }
  0x1b   :  { %p518_p11 = scmp.ne.s32.totalorder %s29_s27, %s517_s8  ;;  %p523_p13 = scmp.lt.s32.totalorder %s517_s8, %s517_s8 }
  0x1d   :  { %p524_p0 = por %p523_p13, %p522_p12 }
  0x1f   :  { %p525_p1 = pnand %p524_p0, %p518_p11 }
  0x21   :  { %528 = shalt.err (!%p525_p1)
}
  0x22   :  { %s561_s0 = smov 512   ;;  %s562_s9 = smov 32  }
  0x23   :  { %34 = dma.hbm_to_vmem [thread:$0]  %s687_s1, 8192, %s29_s27, [#allocation6], %s561_s0, %s561_s0, %s562_s9  }
  0x24   :  { %551 = dma.done.wait [#allocation3], 1024  }
  0x25   :  { %552 = vsyncadd [#allocation3], 4294966272 }
  0x26   :  { %553 = dma.done.wait [#allocation6], 8192  }
  0x27   :  { %554 = vsyncadd [#allocation6], 4294959104  ;;  %v563_v0 = vmov 0.0   ;;  %v52_v1 = vld [vmem:[#allocation5 + $0x8] sm:$0xff]  ;;  %v54_v3 = vld [vmem:[#allocation5 + $0x18] sm:$0xff] }
  0x28   :  { %201 = vmatprep.mubr.f32.mxu0 %v563_v0  ;;  %314 = vmatprep.mubr.f32.mxu1 %v563_v0  ;;  %v56_v2 = vld [vmem:[#allocation5 + $0x28] sm:$0xff]  ;;  %v58_v5 = vld [vmem:[#allocation5 + $0x38] sm:$0xff]  ;;  %v51_v6 = vld [vmem:[#allocation5] sm:$0xff] }
  0x29   :  { %v413_v4 = vpack.c.bf16 %v56_v2, %v52_v1  ;;  %v55_v7 = vld [vmem:[#allocation5 + $0x20] sm:$0xff]  ;;  %v445_v8 = vpack.c.bf16 %v58_v5, %v54_v3  ;;  %v53_v10 = vld [vmem:[#allocation5 + $0x10] sm:$0xff]  ;;  %v60_v12 = vld [vmem:[#allocation5 + $0x48] sm:$0xff] }
  0x2a   :  { %v415_v9 = vpack.c.bf16 %v55_v7, %v51_v6  ;;  %v57_v11 = vld [vmem:[#allocation5 + $0x30] sm:$0xff]  ;;  %v64_v14 = vld [vmem:[#allocation5 + $0x68] sm:$0xff]  ;;  %v62_v15 = vld [vmem:[#allocation5 + $0x58] sm:$0xff] }
  0x2b   :  { %414 = vmatprep.subr.bf16.mxu0 %v413_v4  ;;  %v447_v13 = vpack.c.bf16 %v57_v11, %v53_v10  ;;  %v66_v16 = vld [vmem:[#allocation5 + $0x78] sm:$0xff]  ;;  %446 = vmatprep.subr.bf16.mxu1 %v445_v8  ;;  %v417_v17 = vpack.c.bf16 %v64_v14, %v60_v12  ;;  %v59_v19 = vld [vmem:[#allocation5 + $0x40] sm:$0xff]  ;;  %v61_v21 = vld [vmem:[#allocation5 + $0x50] sm:$0xff] }
  0x2c   :  { %416 = vmatpush1.bf16.msra.mxu0 %v415_v9  ;;  %v449_v18 = vpack.c.bf16 %v66_v16, %v62_v15  ;;  %v63_v20 = vld [vmem:[#allocation5 + $0x60] sm:$0xff]  ;;  %v65_v23 = vld [vmem:[#allocation5 + $0x70] sm:$0xff]  ;;  %v68_v24 = vld [vmem:[#allocation5 + $0x88] sm:$0xff] }
  0x2d   :  { %448 = vmatpush1.bf16.msra.mxu1 %v447_v13  ;;  %v419_v22 = vpack.c.bf16 %v63_v20, %v59_v19  ;;  %v72_v25 = vld [vmem:[#allocation5 + $0xa8] sm:$0xff]  ;;  %418 = vmatprep.subr.bf16.mxu0 %v417_v17  ;;  %v451_v26 = vpack.c.bf16 %v65_v23, %v61_v21  ;;  %v70_v28 = vld [vmem:[#allocation5 + $0x98] sm:$0xff]  ;;  %v67_v30 = vld [vmem:[#allocation5 + $0x80] sm:$0xff] }
  0x2e   :  { %450 = vmatprep.subr.bf16.mxu1 %v449_v18  ;;  %v421_v27 = vpack.c.bf16 %v72_v25, %v68_v24  ;;  %v74_v29 = vld [vmem:[#allocation5 + $0xb8] sm:$0xff]  ;;  %v71_v32 = vld [vmem:[#allocation5 + $0xa0] sm:$0xff]  ;;  %v69_v33 = vld [vmem:[#allocation5 + $0x90] sm:$0xff] }
  0x2f   :  { %v453_v31 = vpack.c.bf16 %v74_v29, %v70_v28  ;;  %v73_v34 = vld [vmem:[#allocation5 + $0xb0] sm:$0xff]  ;;  %v423_v35 = vpack.c.bf16 %v71_v32, %v67_v30  ;;  %v76_v36 = vld [vmem:[#allocation5 + $0xc8] sm:$0xff]  ;;  %v78_v38 = vld [vmem:[#allocation5 + $0xd8] sm:$0xff] }
  0x30   :  { %420 = vmatpush1.bf16.msra.mxu0 %v419_v22  ;;  %v80_v37 = vld [vmem:[#allocation5 + $0xe8] sm:$0xff]  ;;  %v455_v39 = vpack.c.bf16 %v73_v34, %v69_v33  ;;  %v82_v41 = vld [vmem:[#allocation5 + $0xf8] sm:$0xff]  ;;  %v75_v42 = vld [vmem:[#allocation5 + $0xc0] sm:$0xff] }
  0x31   :  { %452 = vmatpush1.bf16.msra.mxu1 %v451_v26  ;;  %422 = vmatprep.subr.bf16.mxu0 %v421_v27  ;;  %v425_v40 = vpack.c.bf16 %v80_v37, %v76_v36  ;;  %v79_v43 = vld [vmem:[#allocation5 + $0xe0] sm:$0xff]  ;;  %v457_v44 = vpack.c.bf16 %v82_v41, %v78_v38  ;;  %v77_v45 = vld [vmem:[#allocation5 + $0xd0] sm:$0xff]  ;;  %v84_v47 = vld [vmem:[#allocation5 + $0x108] sm:$0xff] }
  0x32   :  { %454 = vmatprep.subr.bf16.mxu1 %v453_v31  ;;  %v81_v46 = vld [vmem:[#allocation5 + $0xf0] sm:$0xff]  ;;  %v88_v48 = vld [vmem:[#allocation5 + $0x128] sm:$0xff]  ;;  %v86_v49 = vld [vmem:[#allocation5 + $0x118] sm:$0xff]  ;;  %v427_v51 = vpack.c.bf16 %v79_v43, %v75_v42  ;;  %v117_v42 = vlaneseq }
  0x33   :  { %v90_v50 = vld [vmem:[#allocation5 + $0x138] sm:$0xff]  ;;  %v459_v52 = vpack.c.bf16 %v81_v46, %v77_v45  ;;  %v429_v53 = vpack.c.bf16 %v88_v48, %v84_v47  ;;  %v83_v54 = vld [vmem:[#allocation5 + $0x100] sm:$0xff]  ;;  %v85_v56 = vld [vmem:[#allocation5 + $0x110] sm:$0xff] }
  0x34   :  { %424 = vmatpush1.bf16.msra.mxu0 %v423_v35  ;;  %v87_v55 = vld [vmem:[#allocation5 + $0x120] sm:$0xff]  ;;  %v461_v57 = vpack.c.bf16 %v90_v50, %v86_v49  ;;  %v89_v58 = vld [vmem:[#allocation5 + $0x130] sm:$0xff]  ;;  %v92_v59 = vld [vmem:[#allocation5 + $0x148] sm:$0xff]  ;;  %v118_v43 = vshrl.u32 %v117_v42, 7 }
  0x35   :  { %456 = vmatpush1.bf16.msra.mxu1 %v455_v39  ;;  %426 = vmatprep.subr.bf16.mxu0 %v425_v40  ;;  %v96_v60 = vld [vmem:[#allocation5 + $0x168] sm:$0xff]  ;;  %v94_v61 = vld [vmem:[#allocation5 + $0x158] sm:$0xff]  ;;  %v431_v63 = vpack.c.bf16 %v87_v55, %v83_v54  ;;  %v463_v1 = vpack.c.bf16 %v89_v58, %v85_v56  ;;  %v91_v3 = vld [vmem:[#allocation5 + $0x140] sm:$0xff] }
  0x36   :  { %458 = vmatprep.subr.bf16.mxu1 %v457_v44  ;;  %v98_v62 = vld [vmem:[#allocation5 + $0x178] sm:$0xff]  ;;  %v433_v2 = vpack.c.bf16 %v96_v60, %v92_v59  ;;  %v95_v4 = vld [vmem:[#allocation5 + $0x160] sm:$0xff]  ;;  %v93_v5 = vld [vmem:[#allocation5 + $0x150] sm:$0xff]  ;;  %v119_v44 = vsub.s32 0, %v118_v43  ;;  %v127_v46 = vsub.s32 2, %v118_v43  ;;  %v123_v47 = vsub.s32 1, %v118_v43 }
  0x37   :  { %v465_v6 = vpack.c.bf16 %v98_v62, %v94_v61  ;;  %v97_v7 = vld [vmem:[#allocation5 + $0x170] sm:$0xff]  ;;  %v100_v8 = vld [vmem:[#allocation5 + $0x188] sm:$0xff]  ;;  %v102_v10 = vld [vmem:[#allocation5 + $0x198] sm:$0xff]  ;;  %v435_v12 = vpack.c.bf16 %v95_v4, %v91_v3  ;;  %v131_v48 = vsub.s32 3, %v118_v43 }
  0x38   :  { %428 = vmatpush1.bf16.msra.mxu0 %v427_v51  ;;  %v104_v9 = vld [vmem:[#allocation5 + $0x1a8] sm:$0xff]  ;;  %v106_v11 = vld [vmem:[#allocation5 + $0x1b8] sm:$0xff]  ;;  %v467_v13 = vpack.c.bf16 %v97_v7, %v93_v5  ;;  %v99_v15 = vld [vmem:[#allocation5 + $0x180] sm:$0xff] }
  0x39   :  { %460 = vmatpush1.bf16.msra.mxu1 %v459_v52  ;;  %430 = vmatprep.subr.bf16.mxu0 %v429_v53  ;;  %v437_v14 = vpack.c.bf16 %v104_v9, %v100_v8  ;;  %v103_v16 = vld [vmem:[#allocation5 + $0x1a0] sm:$0xff]  ;;  %v101_v17 = vld [vmem:[#allocation5 + $0x190] sm:$0xff]  ;;  %v469_v18 = vpack.c.bf16 %v106_v11, %v102_v10  ;;  %v108_v20 = vld [vmem:[#allocation5 + $0x1c8] sm:$0xff] }
  0x3a   :  { %462 = vmatprep.subr.bf16.mxu1 %v461_v57  ;;  %v105_v19 = vld [vmem:[#allocation5 + $0x1b0] sm:$0xff]  ;;  %v112_v21 = vld [vmem:[#allocation5 + $0x1e8] sm:$0xff]  ;;  %v110_v22 = vld [vmem:[#allocation5 + $0x1d8] sm:$0xff]  ;;  %v439_v24 = vpack.c.bf16 %v103_v16, %v99_v15 }
  0x3b   :  { %v114_v23 = vld [vmem:[#allocation5 + $0x1f8] sm:$0xff]  ;;  %v471_v25 = vpack.c.bf16 %v105_v19, %v101_v17  ;;  %v441_v26 = vpack.c.bf16 %v112_v21, %v108_v20  ;;  %v107_v27 = vld [vmem:[#allocation5 + $0x1c0] sm:$0xff]  ;;  %v109_v30 = vld [vmem:[#allocation5 + $0x1d0] sm:$0xff] }
  0x3c   :  { %432 = vmatpush1.bf16.msra.mxu0 %v431_v63  ;;  %v111_v28 = vld [vmem:[#allocation5 + $0x1e0] sm:$0xff]  ;;  %v473_v29 = vpack.c.bf16 %v114_v23, %v110_v22  ;;  %v113_v31 = vld [vmem:[#allocation5 + $0x1f0] sm:$0xff]  ;;  %v44_v35 = vld [vmem:[#allocation2 + $0x8] sm:$0xff] }
  0x3d   :  { %464 = vmatpush1.bf16.msra.mxu1 %v463_v1  ;;  %434 = vmatprep.subr.bf16.mxu0 %v433_v2  ;;  %v443_v32 = vpack.c.bf16 %v111_v28, %v107_v27  ;;  %v475_v33 = vpack.c.bf16 %v113_v31, %v109_v30  ;;  %v43_v34 = vld [vmem:[#allocation2] sm:$0xff]  ;;  %v45_v36 = vld [vmem:[#allocation2 + $0x10] sm:$0xff]  ;;  %v46_v37 = vld [vmem:[#allocation2 + $0x18] sm:$0xff] }
  0x3e   :  { %466 = vmatprep.subr.bf16.mxu1 %v465_v6  ;;  %v47_v38 = vld [vmem:[#allocation2 + $0x20] sm:$0xff]  ;;  %v48_v39 = vld [vmem:[#allocation2 + $0x28] sm:$0xff]  ;;  %v49_v40 = vld [vmem:[#allocation2 + $0x30] sm:$0xff] }
  0x3f   :  { %v50_v41 = vld [vmem:[#allocation2 + $0x38] sm:$0xff]  ;;  %v115_v45 = vld [vmem:[%s688_s2] sm:$0xf]  ;;  %s564_s2 = smov [#allocation7]  }
  0x40   :  { %436 = vmatpush1.bf16.msra.mxu0 %v435_v12  ;;  %v631_v49 = vrot.slane %v115_v45, %v119_v44  ;;  %v633_v50 = vrot.slane %v115_v45, %v127_v46  ;;  %v635_v51 = vrot.slane %v115_v45, %v123_v47  ;;  %v637_v52 = vrot.slane %v115_v45, %v131_v48  ;;  %s400_s13 = sshll.u32 %s564_s2, 4  ;;  %s401_s13 = int_to_ptr.vmem [resolvable:$true] %s400_s13 }
  0x41   :  { %468 = vmatpush1.bf16.msra.mxu1 %v467_v13  ;;  %438 = vmatprep.subr.bf16.mxu0 %v437_v14  ;;  %s529_s14 = scalar_lea.vmem %s401_s13, 4096  ;;  %p534_p3 = scmp.lt.s32.totalorder %s401_s13, %s401_s13 }
  0x42   :  { %470 = vmatprep.subr.bf16.mxu1 %v469_v18  ;;  %p530_p2 = scmp.ne.s32.totalorder %s401_s13, %s529_s14  ;;  %p535_p4 = scmp.lt.s32.totalorder %s529_s14, %s529_s14 }
  0x44   :  { %440 = vmatpush1.bf16.msra.mxu0 %v439_v24  ;;  %p536_p5 = por %p535_p4, %p534_p3 }
  0x45   :  { %472 = vmatpush1.bf16.msra.mxu1 %v471_v25  ;;  %442 = vmatprep.subr.bf16.mxu0 %v441_v26 }
  0x46   :  { %474 = vmatprep.subr.bf16.mxu1 %v473_v29  ;;  %p537_p6 = pnand %p536_p5, %p530_p2 }
  0x48   :  { %444 = vmatpush1.bf16.msra.mxu0 %v443_v32 }
  0x49   :  { %476 = vmatpush1.bf16.msra.mxu1 %v475_v33 }
  0x4b   :  { %202 = vmatmul.mubr.f32.vlgmr.msra.gmra.mrb[0].mxu0 %v43_v34 }
  0x4c   :  { %315 = vmatmul.mubr.f32.vlgmr.msra.gmra.mrb[0].mxu1 %v43_v34  ;;  %207 = vmatprep.mubr.f32.mxu0 %v563_v0 }
  0x4d   :  { %320 = vmatprep.mubr.f32.mxu1 %v563_v0 }
  0x4f   :  { %208 = vmatmul.mubr.f32.gmra.mrb[2].mxu0 %v44_v35 }
  0x50   :  { %321 = vmatmul.mubr.f32.gmra.mrb[2].mxu1 %v44_v35  ;;  %213 = vmatprep.mubr.f32.mxu0 %v563_v0 }
  0x51   :  { %326 = vmatprep.mubr.f32.mxu1 %v563_v0 }
  0x53   :  { %214 = vmatmul.mubr.f32.gmra.mrb[4].mxu0 %v45_v36 }
  0x54   :  { %327 = vmatmul.mubr.f32.gmra.mrb[4].mxu1 %v45_v36  ;;  %219 = vmatprep.mubr.f32.mxu0 %v563_v0 }
  0x55   :  { %332 = vmatprep.mubr.f32.mxu1 %v563_v0 }
  0x57   :  { %220 = vmatmul.mubr.f32.gmra.mrb[6].mxu0 %v46_v37 }
  0x58   :  { %333 = vmatmul.mubr.f32.gmra.mrb[6].mxu1 %v46_v37  ;;  %225 = vmatprep.mubr.f32.mxu0 %v563_v0 }
  0x59   :  { %338 = vmatprep.mubr.f32.mxu1 %v563_v0 }
  0x5b   :  { %226 = vmatmul.mubr.f32.gmra.mrb[8].mxu0 %v47_v38 }
  0x5c   :  { %339 = vmatmul.mubr.f32.gmra.mrb[8].mxu1 %v47_v38  ;;  %231 = vmatprep.mubr.f32.mxu0 %v563_v0 }
  0x5d   :  { %344 = vmatprep.mubr.f32.mxu1 %v563_v0 }
  0x5f   :  { %232 = vmatmul.mubr.f32.gmra.mrb[10].mxu0 %v48_v39 }
  0x60   :  { %345 = vmatmul.mubr.f32.gmra.mrb[10].mxu1 %v48_v39  ;;  %237 = vmatprep.mubr.f32.mxu0 %v563_v0 }
  0x61   :  { %350 = vmatprep.mubr.f32.mxu1 %v563_v0 }
  0x63   :  { %238 = vmatmul.mubr.f32.gmra.mrb[12].mxu0 %v49_v40 }
  0x64   :  { %351 = vmatmul.mubr.f32.gmra.mrb[12].mxu1 %v49_v40  ;;  %243 = vmatprep.mubr.f32.mxu0 %v563_v0 }
  0x65   :  { %356 = vmatprep.mubr.f32.mxu1 %v563_v0 }
  0x67   :  { %244 = vmatmul.mubr.f32.gmra.mrb[14].mxu0 %v50_v41 }
  0x68   :  { %357 = vmatmul.mubr.f32.gmra.mrb[14].mxu1 %v50_v41 }
 0x11e   :  { %v203_v0 = vpop.f32.mrb[0].mxu0 }
 0x11f   :  { %v204_v53 = vadd.f32 %v203_v0, %v631_v49  ;;  %v316_v54 = vpop.f32.mrb[0].mxu1  ;;  %v205_v55 = vpop.f32.mrb[1].mxu0 }
 0x120   :  { %v317_v56 = vadd.f32 %v316_v54, %v633_v50  ;;  %v206_v57 = vadd.f32 %v205_v55, %v635_v51  ;;  %v318_v58 = vpop.f32.mrb[1].mxu1 }
 0x121   :  { %363 = vst [vmem:[#allocation7] sm:$0xff] %v204_v53  ;;  %v319_v59 = vadd.f32 %v318_v58, %v637_v52 }
 0x122   :  { %365 = vst [vmem:[#allocation7 + $0x10] sm:$0xff] %v317_v56  ;;  %364 = vst [vmem:[#allocation7 + $0x8] sm:$0xff] %v206_v57  ;;  %v209_v60 = vpop.f32.mrb[2].mxu0 }
 0x123   :  { %366 = vst [vmem:[#allocation7 + $0x18] sm:$0xff] %v319_v59  ;;  %v210_v61 = vadd.f32 %v209_v60, %v631_v49  ;;  %v322_v62 = vpop.f32.mrb[2].mxu1  ;;  %v211_v63 = vpop.f32.mrb[3].mxu0 }
 0x124   :  { %v323_v1 = vadd.f32 %v322_v62, %v633_v50  ;;  %v212_v2 = vadd.f32 %v211_v63, %v635_v51  ;;  %v324_v3 = vpop.f32.mrb[3].mxu1 }
 0x125   :  { %367 = vst [vmem:[#allocation7 + $0x20] sm:$0xff] %v210_v61  ;;  %v325_v4 = vadd.f32 %v324_v3, %v637_v52 }
 0x126   :  { %369 = vst [vmem:[#allocation7 + $0x30] sm:$0xff] %v323_v1  ;;  %368 = vst [vmem:[#allocation7 + $0x28] sm:$0xff] %v212_v2  ;;  %v215_v5 = vpop.f32.mrb[4].mxu0 }
 0x127   :  { %370 = vst [vmem:[#allocation7 + $0x38] sm:$0xff] %v325_v4  ;;  %v216_v6 = vadd.f32 %v215_v5, %v631_v49  ;;  %v328_v7 = vpop.f32.mrb[4].mxu1  ;;  %v217_v8 = vpop.f32.mrb[5].mxu0 }
 0x128   :  { %v329_v9 = vadd.f32 %v328_v7, %v633_v50  ;;  %v218_v10 = vadd.f32 %v217_v8, %v635_v51  ;;  %v330_v11 = vpop.f32.mrb[5].mxu1 }
 0x129   :  { %371 = vst [vmem:[#allocation7 + $0x40] sm:$0xff] %v216_v6  ;;  %v331_v12 = vadd.f32 %v330_v11, %v637_v52 }
 0x12a   :  { %373 = vst [vmem:[#allocation7 + $0x50] sm:$0xff] %v329_v9  ;;  %372 = vst [vmem:[#allocation7 + $0x48] sm:$0xff] %v218_v10  ;;  %v221_v13 = vpop.f32.mrb[6].mxu0 }
 0x12b   :  { %374 = vst [vmem:[#allocation7 + $0x58] sm:$0xff] %v331_v12  ;;  %v222_v14 = vadd.f32 %v221_v13, %v631_v49  ;;  %v334_v15 = vpop.f32.mrb[6].mxu1  ;;  %v223_v16 = vpop.f32.mrb[7].mxu0 }
 0x12c   :  { %v335_v17 = vadd.f32 %v334_v15, %v633_v50  ;;  %v224_v18 = vadd.f32 %v223_v16, %v635_v51  ;;  %v336_v19 = vpop.f32.mrb[7].mxu1 }
 0x12d   :  { %375 = vst [vmem:[#allocation7 + $0x60] sm:$0xff] %v222_v14  ;;  %v337_v20 = vadd.f32 %v336_v19, %v637_v52 }
 0x12e   :  { %377 = vst [vmem:[#allocation7 + $0x70] sm:$0xff] %v335_v17  ;;  %376 = vst [vmem:[#allocation7 + $0x68] sm:$0xff] %v224_v18  ;;  %v227_v21 = vpop.f32.mrb[8].mxu0 }
 0x12f   :  { %378 = vst [vmem:[#allocation7 + $0x78] sm:$0xff] %v337_v20  ;;  %v228_v22 = vadd.f32 %v227_v21, %v631_v49  ;;  %v340_v23 = vpop.f32.mrb[8].mxu1  ;;  %v229_v24 = vpop.f32.mrb[9].mxu0 }
 0x130   :  { %v341_v25 = vadd.f32 %v340_v23, %v633_v50  ;;  %v230_v26 = vadd.f32 %v229_v24, %v635_v51  ;;  %v342_v27 = vpop.f32.mrb[9].mxu1 }
 0x131   :  { %379 = vst [vmem:[#allocation7 + $0x80] sm:$0xff] %v228_v22  ;;  %v343_v28 = vadd.f32 %v342_v27, %v637_v52 }
 0x132   :  { %381 = vst [vmem:[#allocation7 + $0x90] sm:$0xff] %v341_v25  ;;  %380 = vst [vmem:[#allocation7 + $0x88] sm:$0xff] %v230_v26  ;;  %v233_v29 = vpop.f32.mrb[10].mxu0 }
 0x133   :  { %382 = vst [vmem:[#allocation7 + $0x98] sm:$0xff] %v343_v28  ;;  %v234_v30 = vadd.f32 %v233_v29, %v631_v49  ;;  %v346_v31 = vpop.f32.mrb[10].mxu1  ;;  %v235_v32 = vpop.f32.mrb[11].mxu0 }
 0x134   :  { %v347_v33 = vadd.f32 %v346_v31, %v633_v50  ;;  %v236_v34 = vadd.f32 %v235_v32, %v635_v51  ;;  %v348_v35 = vpop.f32.mrb[11].mxu1 }
 0x135   :  { %383 = vst [vmem:[#allocation7 + $0xa0] sm:$0xff] %v234_v30  ;;  %v349_v36 = vadd.f32 %v348_v35, %v637_v52 }
 0x136   :  { %385 = vst [vmem:[#allocation7 + $0xb0] sm:$0xff] %v347_v33  ;;  %384 = vst [vmem:[#allocation7 + $0xa8] sm:$0xff] %v236_v34  ;;  %v239_v37 = vpop.f32.mrb[12].mxu0 }
 0x137   :  { %386 = vst [vmem:[#allocation7 + $0xb8] sm:$0xff] %v349_v36  ;;  %v240_v38 = vadd.f32 %v239_v37, %v631_v49  ;;  %v352_v39 = vpop.f32.mrb[12].mxu1  ;;  %v241_v40 = vpop.f32.mrb[13].mxu0 }
 0x138   :  { %v353_v41 = vadd.f32 %v352_v39, %v633_v50  ;;  %v242_v42 = vadd.f32 %v241_v40, %v635_v51  ;;  %v354_v43 = vpop.f32.mrb[13].mxu1 }
 0x139   :  { %387 = vst [vmem:[#allocation7 + $0xc0] sm:$0xff] %v240_v38  ;;  %v355_v44 = vadd.f32 %v354_v43, %v637_v52 }
 0x13a   :  { %389 = vst [vmem:[#allocation7 + $0xd0] sm:$0xff] %v353_v41  ;;  %388 = vst [vmem:[#allocation7 + $0xc8] sm:$0xff] %v242_v42  ;;  %v245_v45 = vpop.f32.mrb[14].mxu0 }
 0x13b   :  { %390 = vst [vmem:[#allocation7 + $0xd8] sm:$0xff] %v355_v44  ;;  %v246_v46 = vadd.f32 %v245_v45, %v631_v49  ;;  %v358_v47 = vpop.f32.mrb[14].mxu1  ;;  %v247_v48 = vpop.f32.mrb[15].mxu0 }
 0x13c   :  { %v359_v0 = vadd.f32 %v358_v47, %v633_v50  ;;  %v248_v53 = vadd.f32 %v247_v48, %v635_v51  ;;  %v360_v54 = vpop.f32.mrb[15].mxu1 }
 0x13d   :  { %391 = vst [vmem:[#allocation7 + $0xe0] sm:$0xff] %v246_v46  ;;  %v361_v55 = vadd.f32 %v360_v54, %v637_v52 }
 0x13e   :  { %393 = vst [vmem:[#allocation7 + $0xf0] sm:$0xff] %v359_v0  ;;  %392 = vst [vmem:[#allocation7 + $0xe8] sm:$0xff] %v248_v53 }
 0x13f   :  { %394 = vst [vmem:[#allocation7 + $0xf8] sm:$0xff] %v361_v55 }
 0x140   :  { %540 = shalt.err (!%p537_p6)
}
 0x141   :  { %s541_s17 = scalar_lea.hbm %s689_s3, 4096 }
 0x142   :  { %p542_p7 = scmp.ne.s32.totalorder %s689_s3, %s541_s17  ;;  %p545_p8 = scmp.lt.u32.totalorder %s541_s17, %s689_s3 }
 0x144   :  { %p547_p9 = pnand %p545_p8, %p542_p7 }
 0x146   :  { %550 = shalt.err (!%p547_p9)
}
 0x147   :  { %406 = dma.vmem_to_hbm [thread:$0]  %s401_s13, 4096, %s689_s3, [#allocation4], %s561_s0, %s561_s0, %s562_s9  }
 0x148   :  { %555 = dma.done.wait [#allocation4], 4096  }
 0x149   :  { %556 = vsyncadd [#allocation4], 4294963200 }
 0x14a   :  { %410 = vsyncpa [#allocation3], 1 }
 0x14b   :  { %411 = vsyncpa [#allocation6], 1 }
 0x14c   :  { %412 = vsyncpa [#allocation4], 1 }

</bundles_post_ra>
